<compile_context>
chip_gen: v5e
topology: v5e:2x2
jax: 0.10.0
libtpu: 0.0.40
codegen_flags: <defaults>
</compile_context>

<pallas_src>
import functools
import numpy as np
import jax
import jax.numpy as jnp
from jax.experimental import pallas as pl
from jax.experimental.pallas import tpu as pltpu

VMEM_SPEC = pl.BlockSpec(memory_space=pltpu.MemorySpace.VMEM)


def _round_up(v, m):
    return -(-v // m) * m


# ---------------------------------------------------------------------------
# Fused kernel: all GCN2Conv+LeakyReLU layers + the two Linear heads.
# Shapes (all zero-padded, lane-dense):
#   x0_ref : (Np, Fp)  f32      a_ref : (Np, Np)  bf16
#   wg_ref : (L, Fp, Fp) bf16   wd_ref: (Fp, Dp) bf16   bd_ref: (1, Dp) f32
#   wo_ref : (Dp, Op) bf16      bo_ref: (1, Op) f32     o_ref : (Np, Op) f32
# ---------------------------------------------------------------------------
def _fused_kernel(x0_ref, a_ref, wg_ref, wd_ref, bd_ref, wo_ref, bo_ref, o_ref,
                  *, num_gcn_layers, alpha, negative_slope):
    x0_f32 = x0_ref[...]                       # residual source (f32)
    x0_bf = x0_f32.astype(jnp.bfloat16)
    a = a_ref[...]                             # normalized adjacency (bf16)

    x_bf = x0_bf
    for l in range(num_gcn_layers):
        # propagate: A_hat @ x  (MXU, f32 accumulation)
        px = jnp.dot(a, x_bf, preferred_element_type=jnp.float32)
        # GCN2Conv with theta=None (beta=1) and shared weights:
        #   out = ((1-alpha) * A_hat@x + alpha * x_0) @ W_l
        h = (1.0 - alpha) * px + alpha * x0_f32
        h = jnp.dot(h.astype(jnp.bfloat16), wg_ref[l],
                    preferred_element_type=jnp.float32)
        # LeakyReLU (default negative_slope = 0.01)
        h = jnp.where(h >= 0.0, h, negative_slope * h)
        x_bf = h.astype(jnp.bfloat16)

    # Dense head: Linear(dim_feat, dim_dense) -> Linear(dim_dense, dim_out)
    d = jnp.dot(x_bf, wd_ref[...], preferred_element_type=jnp.float32) + bd_ref[...]
    o_ref[...] = (jnp.dot(d.astype(jnp.bfloat16), wo_ref[...],
                          preferred_element_type=jnp.float32) + bo_ref[...])


# ---------------------------------------------------------------------------
# Host graph preprocessing (done ONCE per graph, outside the jitted path):
# PyG gcn_norm with add_self_loops=True, aggregation at the target node.
# ---------------------------------------------------------------------------
def build_gcn2_adjacency(edge_index, num_nodes):
    row, col = np.asarray(edge_index)
    row = np.concatenate([row, np.arange(num_nodes)])     # self loops (w=1)
    col = np.concatenate([col, np.arange(num_nodes)])
    deg = np.zeros(num_nodes, np.float64)
    np.add.at(deg, col, 1.0)
    dis = np.where(deg > 0, deg ** -0.5, 0.0)
    norm = dis[row] * dis[col]
    a = np.zeros((num_nodes, num_nodes), np.float32)
    np.add.at(a, (col, row), norm)                        # a[target, source]
    return a


# ---------------------------------------------------------------------------
# Parameter init (deterministic, synthetic; shapes match the module).
# Weights are zero-padded to 128-lane multiples and cast to bf16 once.
# ---------------------------------------------------------------------------
def init_params(key, dim_feat, dim_dense, dim_out, num_layers):
    L = num_layers - 1                     # number of GCN2Conv layers
    F_pad = _round_up(dim_feat, 128)
    D_pad = _round_up(dim_dense, 128)
    O_pad = _round_up(dim_out, 128)
    keys = jax.random.split(key, L + 2)

    def glorot(k, din, dout):
        s = float(np.sqrt(6.0 / (din + dout)))
        return jax.random.uniform(k, (din, dout), jnp.float32, -s, s)

    def linear(k, din, dout):
        kw, kb = jax.random.split(k)
        s = float(1.0 / np.sqrt(din))
        w = jax.random.uniform(kw, (din, dout), jnp.float32, -s, s)
        b = jax.random.uniform(kb, (dout,), jnp.float32, -s, s)
        return w, b

    def pad2(w, r, c):
        return jnp.zeros((r, c), w.dtype).at[:w.shape[0], :w.shape[1]].set(w)

    gcn_w = jnp.stack(
        [pad2(glorot(keys[l], dim_feat, dim_feat), F_pad, F_pad) for l in range(L)],
        axis=0).astype(jnp.bfloat16)
    wd, bd = linear(keys[L], dim_feat, dim_dense)
    wo, bo = linear(keys[L + 1], dim_dense, dim_out)
    return {
        "gcn_w": gcn_w,                                        # (L, Fp, Fp) bf16
        "dense_w": pad2(wd, F_pad, D_pad).astype(jnp.bfloat16),
        "dense_b": pad2(bd[None, :], 1, D_pad),                # f32
        "out_w": pad2(wo, D_pad, O_pad).astype(jnp.bfloat16),
        "out_b": pad2(bo[None, :], 1, O_pad),                  # f32
    }


# ---------------------------------------------------------------------------
# Jitted forward: pad inputs, one fused pallas_call, slice the valid block.
# ---------------------------------------------------------------------------
@functools.partial(jax.jit, static_argnames=("dim_out", "alpha", "negative_slope"))
def gnn_dsse_forward(params, x, a_hat, *, dim_out, alpha=0.1, negative_slope=0.01):
    N, F = x.shape
    L, F_pad, _ = params["gcn_w"].shape
    O_pad = params["out_w"].shape[1]
    N_pad = _round_up(N, 8)

    x0 = jnp.zeros((N_pad, F_pad), jnp.float32).at[:N, :F].set(
        x.astype(jnp.float32))
    a = jnp.zeros((N_pad, N_pad), jnp.bfloat16).at[:N, :N].set(
        a_hat.astype(jnp.bfloat16))

    kernel = functools.partial(_fused_kernel, num_gcn_layers=L, alpha=alpha,
                               negative_slope=negative_slope)
    out_pad = pl.pallas_call(
        kernel,
        in_specs=[VMEM_SPEC] * 7,
        out_specs=VMEM_SPEC,
        out_shape=jax.ShapeDtypeStruct((N_pad, O_pad), jnp.float32),
    )(x0, a, params["gcn_w"], params["dense_w"], params["dense_b"],
      params["out_w"], params["out_b"])
    return out_pad[:N, :dim_out]


# ---------------------------------------------------------------------------
if __name__ == "__main__":
    # Module hyperparameters (small, consistent with gnn_dsse defaults).
    dim_feat = 32     # channels
    dim_dense = 64
    dim_out = 8
    num_layers = 3    # -> 2 GCN2Conv + LeakyReLU blocks, then 2 Linears
    alpha = 0.1       # main_param

    num_nodes = 16

    key = jax.random.PRNGKey(0)
    k_x, k_p = jax.random.split(key)

    # Node features x: (num_nodes, dim_feat)
    x = jax.random.normal(k_x, (num_nodes, dim_feat), jnp.float32)

    # Deterministic edge list: ring + a few chords, (2, 24)
    src = np.concatenate(
        [np.arange(num_nodes), np.arange(0, num_nodes, 2)]).astype(np.int32)
    dst = np.concatenate(
        [(np.arange(num_nodes) + 1) % num_nodes,
         (np.arange(0, num_nodes, 2) + 3) % num_nodes]).astype(np.int32)
    edge_index = np.stack([src, dst], axis=0)

    # Normalized adjacency built once per graph (cached=True semantics).
    a_hat = jnp.asarray(build_gcn2_adjacency(edge_index, num_nodes))

    params = init_params(k_p, dim_feat, dim_dense, dim_out, num_layers)

    out = gnn_dsse_forward(params, x, a_hat, dim_out=dim_out, alpha=alpha)
    out = jax.block_until_ready(out)
    assert out.shape == (num_nodes, dim_out)
    assert bool(jnp.all(jnp.isfinite(out)))
    print("KERNEL_OK")
</pallas_src>

<mosaic_0001>
module attributes {stable_mosaic.version = 11 : i64} {
  func.func @_fused_kernel(%arg0: memref<16x128xf32, #tpu.memory_space<vmem>>, %arg1: memref<16x16xbf16, #tpu.memory_space<vmem>>, %arg2: memref<2x128x128xbf16, #tpu.memory_space<vmem>>, %arg3: memref<128x128xbf16, #tpu.memory_space<vmem>>, %arg4: memref<1x128xf32, #tpu.memory_space<vmem>>, %arg5: memref<128x128xbf16, #tpu.memory_space<vmem>>, %arg6: memref<1x128xf32, #tpu.memory_space<vmem>>, %arg7: memref<16x128xf32, #tpu.memory_space<vmem>>) attributes {dimension_semantics = [], scalar_prefetch = 0 : i64, scratch_operands = 0 : i64, tpu.core_type = #tpu.core_type<tc>} {
    %c0 = arith.constant 0 : index
    %c0_0 = arith.constant 0 : index
    %0 = vector.load %arg0[%c0, %c0_0] : memref<16x128xf32, #tpu.memory_space<vmem>>, vector<16x128xf32>
    %1 = arith.truncf %0 : vector<16x128xf32> to vector<16x128xbf16>
    %c0_1 = arith.constant 0 : index
    %c0_2 = arith.constant 0 : index
    %2 = vector.load %arg1[%c0_1, %c0_2] : memref<16x16xbf16, #tpu.memory_space<vmem>>, vector<16x16xbf16>
    %cst = arith.constant dense<0.000000e+00> : vector<16x128xf32>
    %3 = tpu.matmul %2, %1, %cst {dimension_numbers = #tpu.dot_dimension_numbers<[1], [0], [0], [1], [0, 0, 1, 1], [], []>} : vector<16x16xbf16>, vector<16x128xbf16>, vector<16x128xf32> -> vector<16x128xf32>
    %cst_3 = arith.constant 0.899999976 : f32
    %4 = vector.broadcast %cst_3 : f32 to vector<16x128xf32>
    %5 = arith.mulf %4, %3 : vector<16x128xf32>
    %cst_4 = arith.constant 1.000000e-01 : f32
    %6 = vector.broadcast %cst_4 : f32 to vector<16x128xf32>
    %7 = arith.mulf %6, %0 : vector<16x128xf32>
    %8 = arith.addf %5, %7 : vector<16x128xf32>
    %9 = arith.truncf %8 : vector<16x128xf32> to vector<16x128xbf16>
    %c0_5 = arith.constant 0 : index
    %c0_6 = arith.constant 0 : index
    %c0_7 = arith.constant 0 : index
    %10 = vector.load %arg2[%c0_5, %c0_6, %c0_7] : memref<2x128x128xbf16, #tpu.memory_space<vmem>>, vector<1x128x128xbf16>
    %11 = vector.shape_cast %10 : vector<1x128x128xbf16> to vector<128x128xbf16>
    %cst_8 = arith.constant dense<0.000000e+00> : vector<16x128xf32>
    %12 = tpu.matmul %9, %11, %cst_8 {dimension_numbers = #tpu.dot_dimension_numbers<[1], [0], [0], [1], [0, 0, 1, 1], [], []>} : vector<16x128xbf16>, vector<128x128xbf16>, vector<16x128xf32> -> vector<16x128xf32>
    %cst_9 = arith.constant 0.000000e+00 : f32
    %13 = vector.broadcast %cst_9 : f32 to vector<16x128xf32>
    %14 = arith.cmpf oge, %12, %13 : vector<16x128xf32>
    %cst_10 = arith.constant 0.00999999977 : f32
    %15 = vector.broadcast %cst_10 : f32 to vector<16x128xf32>
    %16 = arith.mulf %15, %12 : vector<16x128xf32>
    %17 = arith.select %14, %12, %16 : vector<16x128xi1>, vector<16x128xf32>
    %18 = arith.truncf %17 : vector<16x128xf32> to vector<16x128xbf16>
    %cst_11 = arith.constant dense<0.000000e+00> : vector<16x128xf32>
    %19 = tpu.matmul %2, %18, %cst_11 {dimension_numbers = #tpu.dot_dimension_numbers<[1], [0], [0], [1], [0, 0, 1, 1], [], []>} : vector<16x16xbf16>, vector<16x128xbf16>, vector<16x128xf32> -> vector<16x128xf32>
    %cst_12 = arith.constant 0.899999976 : f32
    %20 = vector.broadcast %cst_12 : f32 to vector<16x128xf32>
    %21 = arith.mulf %20, %19 : vector<16x128xf32>
    %cst_13 = arith.constant 1.000000e-01 : f32
    %22 = vector.broadcast %cst_13 : f32 to vector<16x128xf32>
    %23 = arith.mulf %22, %0 : vector<16x128xf32>
    %24 = arith.addf %21, %23 : vector<16x128xf32>
    %25 = arith.truncf %24 : vector<16x128xf32> to vector<16x128xbf16>
    %c1 = arith.constant 1 : index
    %c0_14 = arith.constant 0 : index
    %c0_15 = arith.constant 0 : index
    %26 = vector.load %arg2[%c1, %c0_14, %c0_15] : memref<2x128x128xbf16, #tpu.memory_space<vmem>>, vector<1x128x128xbf16>
    %27 = vector.shape_cast %26 : vector<1x128x128xbf16> to vector<128x128xbf16>
    %cst_16 = arith.constant dense<0.000000e+00> : vector<16x128xf32>
    %28 = tpu.matmul %25, %27, %cst_16 {dimension_numbers = #tpu.dot_dimension_numbers<[1], [0], [0], [1], [0, 0, 1, 1], [], []>} : vector<16x128xbf16>, vector<128x128xbf16>, vector<16x128xf32> -> vector<16x128xf32>
    %cst_17 = arith.constant 0.000000e+00 : f32
    %29 = vector.broadcast %cst_17 : f32 to vector<16x128xf32>
    %30 = arith.cmpf oge, %28, %29 : vector<16x128xf32>
    %cst_18 = arith.constant 0.00999999977 : f32
    %31 = vector.broadcast %cst_18 : f32 to vector<16x128xf32>
    %32 = arith.mulf %31, %28 : vector<16x128xf32>
    %33 = arith.select %30, %28, %32 : vector<16x128xi1>, vector<16x128xf32>
    %34 = arith.truncf %33 : vector<16x128xf32> to vector<16x128xbf16>
    %c0_19 = arith.constant 0 : index
    %c0_20 = arith.constant 0 : index
    %35 = vector.load %arg3[%c0_19, %c0_20] : memref<128x128xbf16, #tpu.memory_space<vmem>>, vector<128x128xbf16>
    %cst_21 = arith.constant dense<0.000000e+00> : vector<16x128xf32>
    %36 = tpu.matmul %34, %35, %cst_21 {dimension_numbers = #tpu.dot_dimension_numbers<[1], [0], [0], [1], [0, 0, 1, 1], [], []>} : vector<16x128xbf16>, vector<128x128xbf16>, vector<16x128xf32> -> vector<16x128xf32>
    %c0_22 = arith.constant 0 : index
    %c0_23 = arith.constant 0 : index
    %37 = vector.load %arg4[%c0_22, %c0_23] : memref<1x128xf32, #tpu.memory_space<vmem>>, vector<1x128xf32>
    %38 = vector.broadcast %37 : vector<1x128xf32> to vector<16x128xf32>
    %39 = arith.addf %36, %38 : vector<16x128xf32>
    %40 = arith.truncf %39 : vector<16x128xf32> to vector<16x128xbf16>
    %c0_24 = arith.constant 0 : index
    %c0_25 = arith.constant 0 : index
    %41 = vector.load %arg5[%c0_24, %c0_25] : memref<128x128xbf16, #tpu.memory_space<vmem>>, vector<128x128xbf16>
    %cst_26 = arith.constant dense<0.000000e+00> : vector<16x128xf32>
    %42 = tpu.matmul %40, %41, %cst_26 {dimension_numbers = #tpu.dot_dimension_numbers<[1], [0], [0], [1], [0, 0, 1, 1], [], []>} : vector<16x128xbf16>, vector<128x128xbf16>, vector<16x128xf32> -> vector<16x128xf32>
    %c0_27 = arith.constant 0 : index
    %c0_28 = arith.constant 0 : index
    %43 = vector.load %arg6[%c0_27, %c0_28] : memref<1x128xf32, #tpu.memory_space<vmem>>, vector<1x128xf32>
    %44 = vector.broadcast %43 : vector<1x128xf32> to vector<16x128xf32>
    %45 = arith.addf %42, %44 : vector<16x128xf32>
    %c0_29 = arith.constant 0 : index
    %c0_30 = arith.constant 0 : index
    %46 = vector.load %arg7[%c0_29, %c0_30] : memref<16x128xf32, #tpu.memory_space<vmem>>, vector<16x128xf32>
    tpu.vector_store %arg7[%c0_29, %c0_30], %45 {strides = array<i32>} : memref<16x128xf32, #tpu.memory_space<vmem>>, vector<16x128xf32>,
    return
  }
}

</mosaic_0001>

<bundles_post_ra>
// kernel: gnn_dsse_forward.1
= control target key start
LH: loop header
LB: loop body
LE: loop exit
PB: predicated region body
PF: predicated region fallthrough
CT: control target
= control target key end

     0   :  { %12 = vsyncpa [#allocation3], 0  ;;  %s779_s0 = inlined_call_operand.vmem [shape: f32[16,128], index: 0, kind: input, shape index: {}]   ;;  %s780_s1 = inlined_call_operand.vmem [shape: bf16[16,16], index: 1, kind: input, shape index: {}]   ;;  %s781_s2 = inlined_call_operand.hbm [shape: bf16[2,128,128], index: 2, kind: input, shape index: {}]   ;;  %s782_s3 = inlined_call_operand.vmem [shape: bf16[128,128], index: 3, kind: input, shape index: {}]   ;;  %s783_s4 = inlined_call_operand.vmem [shape: f32[1,128], index: 4, kind: input, shape index: {}]   ;;  %s784_s5 = inlined_call_operand.hbm [shape: bf16[128,128], index: 5, kind: input, shape index: {}]   ;;  %s785_s6 = inlined_call_operand.vmem [shape: f32[1,128], index: 6, kind: input, shape index: {}]   ;;  %s786_s7 = inlined_call_operand.vmem [shape: f32[16,128], index: 7, kind: output, shape index: {}]  }
   0x1   :  { %s22_s26 = sshll.u32 %s781_s2, 4  ;;  %s23_s26 = int_to_ptr.hbm [resolvable:$true] %s22_s26 }
   0x2   :  { %13 = vsyncpa [#allocation5], 0  ;;  %s682_s27 = smov [#allocation2]   ;;  %s39_s8 = sshll.u32 %s784_s5, 4  ;;  %s40_s8 = int_to_ptr.hbm [resolvable:$true] %s39_s8 }
   0x3   :  { %s24_s28 = sshll.u32 %s682_s27, 4  ;;  %s683_s9 = smov 64   ;;  %s25_s28 = int_to_ptr.vmem [resolvable:$true] %s24_s28 }
   0x4   :  { %s684_s10 = smov 4   ;;  %s685_s11 = smov [#allocation4]  }
   0x5   :  { %30 = dma.hbm_to_vmem [thread:$0]  %s23_s26, 2048, %s25_s28, [#allocation3], %s683_s9, %s683_s9, %s684_s10  }
   0x6   :  { %s41_s12 = sshll.u32 %s685_s11, 4  ;;  %s42_s12 = int_to_ptr.vmem [resolvable:$true] %s41_s12 }
   0x7   :  { %47 = dma.hbm_to_vmem [thread:$0]  %s40_s8, 1024, %s42_s12, [#allocation5], %s683_s9, %s683_s9, %s684_s10  }
   0x8   :  { %678 = dma.done.wait [#allocation3], 2048  }
   0x9   :  { %679 = vsyncadd [#allocation3], 4294965248 }
   0xa   :  { %680 = dma.done.wait [#allocation5], 1024  }
   0xb   :  { %681 = vsyncadd [#allocation5], 4294966272  ;;  %v59_v0 = vld [vmem:[%s779_s0] sm:$0xff]  ;;  %v60_v1 = vld [vmem:[%s779_s0 + $0x8] sm:$0xff]  ;;  %vm69_vm0 = vcmask 130048  }
   0xc   :  { %v61_v2 = vpack.c.bf16 %v60_v1, %v59_v0  ;;  %v599_v3 = vld [vmem:[#allocation2 + $0x38] sm:$0xff]  ;;  %v591_v4 = vld [vmem:[%s780_s1] sm:$0xff]  ;;  %v598_v5 = vld [vmem:[#allocation2 + $0x30] sm:$0xff]  ;;  %v89_v13 = vmul.f32 0.1, %v59_v0 }
   0xd   :  { %158 = vmatpush.bf16.msra.mxu1 %v599_v3  ;;  %v597_v6 = vld [vmem:[#allocation2 + $0x28] sm:$0xff]  ;;  %v596_v7 = vld [vmem:[#allocation2 + $0x20] sm:$0xff]  ;;  %v595_v8 = vld [vmem:[#allocation2 + $0x18] sm:$0xff]  ;;  %v90_v14 = vmul.f32 0.1, %v60_v1 }
   0xe   :  { %80 = vmatpush.bf16.msra.mxu0 %v61_v2  ;;  %v594_v9 = vld [vmem:[#allocation2 + $0x10] sm:$0xff]  ;;  %v593_v10 = vld [vmem:[#allocation2 + $0x8] sm:$0xff]  ;;  %v592_v11 = vld [vmem:[#allocation2] sm:$0xff] }
   0xf   :  { %v607_v21 = vld [vmem:[#allocation2 + $0x78] sm:$0xff]  ;;  %v606_v22 = vld [vmem:[#allocation2 + $0x70] sm:$0xff]  ;;  %v605_v23 = vld [vmem:[#allocation2 + $0x68] sm:$0xff] }
  0x10   :  { %263 = vmatpush.bf16.msra.mxu3 %v607_v21  ;;  %v604_v24 = vld [vmem:[#allocation2 + $0x60] sm:$0xff]  ;;  %v603_v32 = vld [vmem:[#allocation2 + $0x58] sm:$0xff]  ;;  %v602_v33 = vld [vmem:[#allocation2 + $0x50] sm:$0xff] }
  0x11   :  { %461 = vmatmul.msk.bf16.vlgmr.msra.gmra.mxu0 %vm69_vm0, %v591_v4  ;;  %159 = vmatpush.bf16.msra.mxu1 %v598_v5  ;;  %v601_v34 = vld [vmem:[#allocation2 + $0x48] sm:$0xff]  ;;  %v600_v35 = vld [vmem:[#allocation2 + $0x40] sm:$0xff]  ;;  %v615_v36 = vld [vmem:[%s782_s3 + $0x38] sm:$0xff] }
  0x12   :  { %352 = vmatpush.bf16.msrb.mxu0 %v615_v36  ;;  %v614_v37 = vld [vmem:[%s782_s3 + $0x30] sm:$0xff]  ;;  %v613_v38 = vld [vmem:[%s782_s3 + $0x28] sm:$0xff]  ;;  %v612_v39 = vld [vmem:[%s782_s3 + $0x20] sm:$0xff] }
  0x13   :  { %v611_v40 = vld [vmem:[%s782_s3 + $0x18] sm:$0xff]  ;;  %v610_v48 = vld [vmem:[%s782_s3 + $0x10] sm:$0xff]  ;;  %v609_v49 = vld [vmem:[%s782_s3 + $0x8] sm:$0xff] }
  0x14   :  { %264 = vmatpush.bf16.msra.mxu3 %v606_v22  ;;  %v608_v50 = vld [vmem:[%s782_s3] sm:$0xff]  ;;  %v623_v51 = vld [vmem:[#allocation4 + $0x38] sm:$0xff]  ;;  %v622_v52 = vld [vmem:[#allocation4 + $0x30] sm:$0xff] }
  0x15   :  { %160 = vmatpush.bf16.msra.mxu1 %v597_v6  ;;  %v621_v53 = vld [vmem:[#allocation4 + $0x28] sm:$0xff]  ;;  %v620_v54 = vld [vmem:[#allocation4 + $0x20] sm:$0xff]  ;;  %v619_v55 = vld [vmem:[#allocation4 + $0x18] sm:$0xff] }
  0x16   :  { %353 = vmatpush.bf16.msrb.mxu0 %v614_v37  ;;  %v618_v63 = vld [vmem:[#allocation4 + $0x10] sm:$0xff]  ;;  %v617_v0 = vld [vmem:[#allocation4 + $0x8] sm:$0xff]  ;;  %v616_v1 = vld [vmem:[#allocation4] sm:$0xff] }
  0x17   :  { %v628_v3 = vld [vmem:[%s783_s4] ss:$0 sm:$0xff] }
  0x18   :  { %265 = vmatpush.bf16.msra.mxu3 %v605_v23 }
  0x19   :  { %161 = vmatpush.bf16.msra.mxu1 %v596_v7 }
  0x1a   :  { %354 = vmatpush.bf16.msrb.mxu0 %v613_v38 }
  0x1c   :  { %266 = vmatpush.bf16.msra.mxu3 %v604_v24 }
  0x1d   :  { %162 = vmatpush.bf16.msra.mxu1 %v595_v8  ;;  %v629_v8 = vld [vmem:[%s785_s6] ss:$0 sm:$0xff] }
  0x1e   :  { %355 = vmatpush.bf16.msrb.mxu0 %v612_v39 }
  0x20   :  { %267 = vmatpush.bf16.msra.mxu3 %v603_v32 }
  0x21   :  { %163 = vmatpush.bf16.msra.mxu1 %v594_v9 }
  0x22   :  { %356 = vmatpush.bf16.msrb.mxu0 %v611_v40 }
  0x24   :  { %268 = vmatpush.bf16.msra.mxu3 %v602_v33 }
  0x25   :  { %164 = vmatpush.bf16.msra.mxu1 %v593_v10 }
  0x26   :  { %357 = vmatpush.bf16.msrb.mxu0 %v610_v48 }
  0x28   :  { %269 = vmatpush.bf16.msra.mxu3 %v601_v34 }
  0x29   :  { %165 = vmatpush.bf16.msra.mxu1 %v592_v11 }
  0x2a   :  { %358 = vmatpush.bf16.msrb.mxu0 %v609_v49 }
  0x2c   :  { %270 = vmatpush.bf16.msra.mxu3 %v600_v35 }
  0x2e   :  { %359 = vmatpush.bf16.msrb.mxu0 %v608_v50 }
  0x8e   :  { %v82_v12 = vpop.f32.mrf.mxu0 }
  0x8f   :  { %v87_v15 = vmul.f32 0.9, %v82_v12 }
  0x91   :  { %v91_v18 = vadd.f32 %v89_v13, %v87_v15 }
  0x96   :  { %v84_v16 = vpop.f32.mrf.mxu0 }
  0x97   :  { %v88_v17 = vmul.f32 0.9, %v84_v16 }
  0x99   :  { %v92_v19 = vadd.f32 %v90_v14, %v88_v17 }
  0x9b   :  { %v93_v20 = vpack.c.bf16 %v92_v19, %v91_v18 }
  0x9d   :  { %166 = vmatmul.bf16.vlgmr.msra.gmra.mxu1 %v93_v20 }
 0x11a   :  { %v167_v25 = vpop.f32.mrf.mxu1 }
 0x11b   :  { %v174_v26 = vmul.f32 0.01, %v167_v25  ;;  %vm172_vm1 = vcmp.ge.f32.partialorder %v167_v25, 0.0 }
 0x11d   :  { %v176_v29 = vsel %vm172_vm1, %v167_v25, %v174_v26 }
 0x122   :  { %v169_v27 = vpop.f32.mrf.mxu1 }
 0x123   :  { %vm173_vm2 = vcmp.ge.f32.partialorder %v169_v27, 0.0  ;;  %v175_v28 = vmul.f32 0.01, %v169_v27 }
 0x125   :  { %v177_v30 = vsel %vm173_vm2, %v169_v27, %v175_v28 }
 0x126   :  { %v178_v31 = vpack.c.bf16 %v177_v30, %v176_v29 }
 0x128   :  { %186 = vmatpush.bf16.msra.mxu2 %v178_v31 }
 0x12b   :  { %494 = vmatmul.msk.bf16.vlgmr.msra.gmra.mxu2 %vm69_vm0, %v591_v4 }
 0x12c   :  { %435 = vmatpush.bf16.msrb.mxu2 %v623_v51 }
 0x130   :  { %436 = vmatpush.bf16.msrb.mxu2 %v622_v52 }
 0x134   :  { %437 = vmatpush.bf16.msrb.mxu2 %v621_v53 }
 0x138   :  { %438 = vmatpush.bf16.msrb.mxu2 %v620_v54 }
 0x13c   :  { %439 = vmatpush.bf16.msrb.mxu2 %v619_v55 }
 0x140   :  { %440 = vmatpush.bf16.msrb.mxu2 %v618_v63 }
 0x144   :  { %441 = vmatpush.bf16.msrb.mxu2 %v617_v0 }
 0x148   :  { %442 = vmatpush.bf16.msrb.mxu2 %v616_v1 }
 0x1ae   :  { %v188_v41 = vpop.f32.mrf.mxu2 }
 0x1af   :  { %v193_v42 = vmul.f32 0.9, %v188_v41 }
 0x1b1   :  { %v195_v45 = vadd.f32 %v193_v42, %v89_v13 }
 0x1b6   :  { %v190_v43 = vpop.f32.mrf.mxu2 }
 0x1b7   :  { %v194_v44 = vmul.f32 0.9, %v190_v43 }
 0x1b9   :  { %v196_v46 = vadd.f32 %v194_v44, %v90_v14 }
 0x1bb   :  { %v197_v47 = vpack.c.bf16 %v196_v46, %v195_v45 }
 0x1bd   :  { %271 = vmatmul.bf16.vlgmr.msra.gmra.mxu3 %v197_v47 }
 0x240   :  { %v272_v56 = vpop.f32.mrf.mxu3 }
 0x241   :  { %v279_v57 = vmul.f32 0.01, %v272_v56  ;;  %vm277_vm3 = vcmp.ge.f32.partialorder %v272_v56, 0.0 }
 0x243   :  { %v281_v60 = vsel %vm277_vm3, %v272_v56, %v279_v57 }
 0x248   :  { %v274_v58 = vpop.f32.mrf.mxu3 }
 0x249   :  { %vm278_vm4 = vcmp.ge.f32.partialorder %v274_v58, 0.0  ;;  %v280_v59 = vmul.f32 0.01, %v274_v58 }
 0x24b   :  { %v282_v61 = vsel %vm278_vm4, %v274_v58, %v280_v59 }
 0x24c   :  { %v283_v62 = vpack.c.bf16 %v282_v61, %v281_v60 }
 0x24e   :  { %360 = vmatmul.bf16.vlgmr.msrb.gmra.mxu0 %v283_v62 }
 0x2cb   :  { %v361_v2 = vpop.f32.mrf.mxu0 }
 0x2cc   :  { %v362_v5 = vadd.f32 %v628_v3, %v361_v2 }
 0x2d3   :  { %v363_v4 = vpop.f32.mrf.mxu0 }
 0x2d4   :  { %v364_v6 = vadd.f32 %v628_v3, %v363_v4 }
 0x2d6   :  { %v366_v7 = vpack.c.bf16 %v364_v6, %v362_v5 }
 0x2d8   :  { %443 = vmatmul.bf16.vlgmr.msrb.gmra.mxu2 %v366_v7 }
 0x35b   :  { %v444_v9 = vpop.f32.mrf.mxu2 }
 0x35c   :  { %v445_v10 = vadd.f32 %v629_v8, %v444_v9 }
 0x35e   :  { %449 = vst [vmem:[%s786_s7] sm:$0xff] %v445_v10 }
 0x363   :  { %v446_v11 = vpop.f32.mrf.mxu2 }
 0x364   :  { %v447_v12 = vadd.f32 %v629_v8, %v446_v11 }
 0x366   :  { %450 = vst [vmem:[%s786_s7 + $0x8] sm:$0xff] %v447_v12 }
 0x367   :  { %455 = vsyncpa [#allocation3], 1 }
 0x368   :  { %456 = vsyncpa [#allocation5], 1 }

</bundles_post_ra>
